<compile_context>
chip_gen: v7x
topology: tpu7x:2x2x1
jax: 0.10.0
libtpu: 0.0.40
codegen_flags: <defaults>
</compile_context>

<pallas_src>
import jax
import jax.numpy as jnp
from jax.experimental import pallas as pl
from jax.experimental.pallas import tpu as pltpu

DIMS = 32                      # module feature dim
NUM_BNKS = 3                   # module self.num_bnks
NUM_LAYERS = 4                 # module self.num_layers
HID = DIMS + NUM_BNKS          # 35 (logical hidden width)
HID_PAD = 128                  # lane-aligned hidden width used inside the kernel
OUT_PAD = 8                    # narrow output width (first NUM_BNKS lanes valid)


def _round_up(n, m):
    return ((n + m - 1) // m) * m


def _bottlenecks_kernel(x_ref,
                        w0_ref, b0_ref,
                        w1_ref, b1_ref,
                        w2_ref, b2_ref,
                        w3_ref, b3_ref,
                        out_ref):
    # x_ref: (TM, DIMS) f32; wN_ref: (in_pad, HID_PAD) bf16; bN_ref: (1, HID_PAD) f32
    # out_ref: (TM, OUT_PAD) f32 -- only the first NUM_BNKS lanes are meaningful.
    bf16 = jnp.bfloat16

    # Layer 0: Linear(DIMS, HID) + ReLU (bf16 operands, f32 accumulate).
    h = jnp.dot(x_ref[...].astype(bf16), w0_ref[...],
                preferred_element_type=jnp.float32)
    h = jnp.maximum(h + b0_ref[...], 0.0)

    # cut() -> cat() is an exact identity because the hidden width equals
    # DIMS + NUM_BNKS (asserted in the wrapper), so layers 1..2 are plain
    # Linear + ReLU on h.  Dropout is eval-mode identity.
    for w_ref, b_ref in ((w1_ref, b1_ref), (w2_ref, b2_ref)):
        h = jnp.dot(h.astype(bf16), w_ref[...],
                    preferred_element_type=jnp.float32)
        h = jnp.maximum(h + b_ref[...], 0.0)

    # Layer 3 with the final bottleneck slice folded in: W3/b3 were pre-sliced
    # to the last NUM_BNKS output columns (then lane-padded to 128), so lanes
    # 0..NUM_BNKS-1 of `o` are the bottleneck outputs.  Keep the matmul
    # lane-dense at 128 and narrow only at the store.
    o = jnp.dot(h.astype(bf16), w3_ref[...],
                preferred_element_type=jnp.float32)
    o = jnp.maximum(o + b3_ref[...], 0.0)
    out_ref[...] = o[:, :OUT_PAD].astype(out_ref.dtype)


def prepare_params(params):
    """Pad / pre-slice / bf16-cast the weights ONCE (hoisted out of forward).

    params: list of (W, b) with W shaped (in_features, out_features), b (1, out).
    Zero padding is exact through Linear+ReLU: padded rows of the next layer's
    weights are zero, so padded lanes stay zero.
    """
    assert HID == DIMS + NUM_BNKS  # required for the cut/cat identity
    (w0, b0), (w1, b1), (w2, b2), (w3, b3) = params

    def pad_to(a, rows, cols):
        return jnp.pad(a, ((0, rows - a.shape[0]), (0, cols - a.shape[1])))

    bf16 = jnp.bfloat16
    w0p = pad_to(w0, DIMS, HID_PAD).astype(bf16)          # (32, 128) bf16
    b0p = pad_to(b0, 1, HID_PAD)                          # (1, 128) f32
    w1p = pad_to(w1, HID_PAD, HID_PAD).astype(bf16)       # (128, 128) bf16
    b1p = pad_to(b1, 1, HID_PAD)
    w2p = pad_to(w2, HID_PAD, HID_PAD).astype(bf16)
    b2p = pad_to(b2, 1, HID_PAD)
    # Fold the final column slice (last NUM_BNKS outputs) into the last matmul.
    w3p = pad_to(w3[:, DIMS:], HID_PAD, HID_PAD).astype(bf16)
    b3p = pad_to(b3[:, DIMS:], 1, HID_PAD)
    return (w0p, b0p, w1p, b1p, w2p, b2p, w3p, b3p)


def bottlenecks_forward(x, prepared, *, tm=2048):
    """x: (B, S, DIMS) float32.  prepared: output of prepare_params()."""
    B, S, D = x.shape
    assert D == DIMS

    M = B * S
    x2 = x.reshape(M, D)
    w0p, b0p, w1p, b1p, w2p, b2p, w3p, b3p = prepared

    # Row tile: multiple of 8, as large as requested, but keep >= 2 tiles when
    # possible so the "parallel" grid axis can shard across v7x's 2 TensorCores.
    tm = _round_up(max(tm, 8), 8)
    tm_eff = min(tm, _round_up(M, 8))
    if M > 8 and pl.cdiv(M, tm_eff) < 2:
        tm_eff = max(8, _round_up(pl.cdiv(M, 2), 8))
    grid = (pl.cdiv(M, tm_eff),)

    resident = lambda shape: pl.BlockSpec(shape, lambda i: (0,) * len(shape))

    # Useful (un-padded) FLOPs and actual HBM bytes for the scheduler hint.
    flops = 2 * M * (DIMS * HID + (NUM_LAYERS - 1) * HID * HID)
    weight_bytes = sum(int(a.size) * a.dtype.itemsize
                       for a in (w0p, b0p, w1p, b1p, w2p, b2p, w3p, b3p))
    bytes_accessed = M * DIMS * 4 + M * OUT_PAD * 4 + weight_bytes

    out2 = pl.pallas_call(
        _bottlenecks_kernel,
        out_shape=jax.ShapeDtypeStruct((M, OUT_PAD), jnp.float32),
        grid=grid,
        in_specs=[
            pl.BlockSpec((tm_eff, DIMS), lambda i: (i, 0)),      # streamed rows
            resident((DIMS, HID_PAD)), resident((1, HID_PAD)),
            resident((HID_PAD, HID_PAD)), resident((1, HID_PAD)),
            resident((HID_PAD, HID_PAD)), resident((1, HID_PAD)),
            resident((HID_PAD, HID_PAD)), resident((1, HID_PAD)),
        ],
        out_specs=pl.BlockSpec((tm_eff, OUT_PAD), lambda i: (i, 0)),
        compiler_params=pltpu.CompilerParams(
            dimension_semantics=("parallel",)),    # 2-TC sharding on v7x
        cost_estimate=pl.CostEstimate(
            flops=flops, transcendentals=0, bytes_accessed=bytes_accessed),
    )(x2, w0p, b0p, w1p, b1p, w2p, b2p, w3p, b3p)

    # Drop the (tiny) lane padding and restore (B, S, NUM_BNKS).
    return out2[:, :NUM_BNKS].reshape(B, S, NUM_BNKS)


def init_params(key):
    """Deterministic parameter init mirroring nn.Linear shapes.

    Layer 0: Linear(DIMS, HID); layers 1..3: Linear(HID, HID).
    Weights are stored transposed, i.e. (in_features, out_features).
    """
    params = []
    in_dims = [DIMS] + [HID] * (NUM_LAYERS - 1)
    for fan_in in in_dims:
        kw, kb, key = jax.random.split(key, 3)
        bound = 1.0 / (fan_in ** 0.5)
        w = jax.random.uniform(kw, (fan_in, HID), jnp.float32, -bound, bound)
        b = jax.random.uniform(kb, (1, HID), jnp.float32, -bound, bound)
        params.append((w, b))
    return params


def reference_forward(x, params):
    """Pure-JAX f32 reference of the module's forward (eval-mode dropout)."""
    h = x
    for li, (w, b) in enumerate(params):
        if li == 0:
            h = jnp.maximum(jnp.einsum('bsd,dh->bsh', h, w) + b[0], 0.0)
        else:
            bbox, bnk = h[:, :, :DIMS], h[:, :, -NUM_BNKS:]
            h = jnp.concatenate([bbox, bnk], axis=-1)
            h = jnp.maximum(jnp.einsum('bsd,dh->bsh', h, w) + b[0], 0.0)
    return h[:, :, -NUM_BNKS:]


if __name__ == "__main__":
    key = jax.random.PRNGKey(0)
    kx, kp, kx2 = jax.random.split(key, 3)

    params = init_params(kp)
    prepared = prepare_params(params)   # pad + bf16-cast once, reused per call

    # Small shape consistent with the module's (batch, seq, dims) input.
    B, S = 2, 8
    x = jax.random.normal(kx, (B, S, DIMS), jnp.float32)
    out = jax.block_until_ready(bottlenecks_forward(x, prepared))
    ref = reference_forward(x, params)
    assert out.shape == (B, S, NUM_BNKS)
    # bf16 MXU operands with f32 accumulation -> loosened tolerance vs f32 ref.
    assert jnp.allclose(out, ref, atol=2e-2, rtol=2e-2), \
        float(jnp.max(jnp.abs(out - ref)))

    # Exercise the multi-tile path with a partial last row-block.
    B2, S2 = 3, 337            # M = 1011, not a multiple of tm
    x_big = jax.random.normal(kx2, (B2, S2, DIMS), jnp.float32)
    out_big = jax.block_until_ready(bottlenecks_forward(x_big, prepared, tm=256))
    ref_big = reference_forward(x_big, params)
    assert out_big.shape == (B2, S2, NUM_BNKS)
    assert jnp.allclose(out_big, ref_big, atol=2e-2, rtol=2e-2), \
        float(jnp.max(jnp.abs(out_big - ref_big)))

    print("KERNEL_OK")
</pallas_src>

<mosaic_0001>
module attributes {stable_mosaic.version = 11 : i64} {
  func.func @_bottlenecks_kernel(%arg0: i32, %arg1: memref<8x32xf32, #tpu.memory_space<vmem>>, %arg2: memref<32x128xbf16, #tpu.memory_space<vmem>>, %arg3: memref<1x128xf32, #tpu.memory_space<vmem>>, %arg4: memref<128x128xbf16, #tpu.memory_space<vmem>>, %arg5: memref<1x128xf32, #tpu.memory_space<vmem>>, %arg6: memref<128x128xbf16, #tpu.memory_space<vmem>>, %arg7: memref<1x128xf32, #tpu.memory_space<vmem>>, %arg8: memref<128x128xbf16, #tpu.memory_space<vmem>>, %arg9: memref<1x128xf32, #tpu.memory_space<vmem>>, %arg10: memref<8x8xf32, #tpu.memory_space<vmem>>) attributes {dimension_semantics = [#tpu.dimension_semantics<parallel>], iteration_bounds = array<i64: 2>, scalar_prefetch = 0 : i64, scratch_operands = 0 : i64, tpu.core_type = #tpu.core_type<tc>, window_params = [{transform_indices = @transform_0, window_bounds = array<i64: 8, 32>}, {pipeline_mode = #tpu.pipeline_mode<synchronous>, transform_indices = @transform_1, window_bounds = array<i64: 32, 128>}, {pipeline_mode = #tpu.pipeline_mode<synchronous>, transform_indices = @transform_2, window_bounds = array<i64: 1, 128>}, {pipeline_mode = #tpu.pipeline_mode<synchronous>, transform_indices = @transform_3, window_bounds = array<i64: 128, 128>}, {pipeline_mode = #tpu.pipeline_mode<synchronous>, transform_indices = @transform_4, window_bounds = array<i64: 1, 128>}, {pipeline_mode = #tpu.pipeline_mode<synchronous>, transform_indices = @transform_5, window_bounds = array<i64: 128, 128>}, {pipeline_mode = #tpu.pipeline_mode<synchronous>, transform_indices = @transform_6, window_bounds = array<i64: 1, 128>}, {pipeline_mode = #tpu.pipeline_mode<synchronous>, transform_indices = @transform_7, window_bounds = array<i64: 128, 128>}, {pipeline_mode = #tpu.pipeline_mode<synchronous>, transform_indices = @transform_8, window_bounds = array<i64: 1, 128>}, {transform_indices = @transform_9, window_bounds = array<i64: 8, 8>}]} {
    %c0 = arith.constant 0 : index
    %c0_0 = arith.constant 0 : index
    %0 = vector.load %arg1[%c0, %c0_0] : memref<8x32xf32, #tpu.memory_space<vmem>>, vector<8x32xf32>
    %1 = arith.truncf %0 : vector<8x32xf32> to vector<8x32xbf16>
    %c0_1 = arith.constant 0 : index
    %c0_2 = arith.constant 0 : index
    %2 = vector.load %arg2[%c0_1, %c0_2] : memref<32x128xbf16, #tpu.memory_space<vmem>>, vector<32x128xbf16>
    %cst = arith.constant dense<0.000000e+00> : vector<8x128xf32>
    %3 = tpu.matmul %1, %2, %cst {dimension_numbers = #tpu.dot_dimension_numbers<[1], [0], [0], [1], [0, 0, 1, 1], [], []>} : vector<8x32xbf16>, vector<32x128xbf16>, vector<8x128xf32> -> vector<8x128xf32>
    %c0_3 = arith.constant 0 : index
    %c0_4 = arith.constant 0 : index
    %4 = vector.load %arg3[%c0_3, %c0_4] : memref<1x128xf32, #tpu.memory_space<vmem>>, vector<1x128xf32>
    %5 = vector.broadcast %4 : vector<1x128xf32> to vector<8x128xf32>
    %6 = arith.addf %3, %5 : vector<8x128xf32>
    %cst_5 = arith.constant 0.000000e+00 : f32
    %7 = vector.broadcast %cst_5 : f32 to vector<8x128xf32>
    %8 = arith.maximumf %6, %7 : vector<8x128xf32>
    %9 = arith.truncf %8 : vector<8x128xf32> to vector<8x128xbf16>
    %c0_6 = arith.constant 0 : index
    %c0_7 = arith.constant 0 : index
    %10 = vector.load %arg4[%c0_6, %c0_7] : memref<128x128xbf16, #tpu.memory_space<vmem>>, vector<128x128xbf16>
    %cst_8 = arith.constant dense<0.000000e+00> : vector<8x128xf32>
    %11 = tpu.matmul %9, %10, %cst_8 {dimension_numbers = #tpu.dot_dimension_numbers<[1], [0], [0], [1], [0, 0, 1, 1], [], []>} : vector<8x128xbf16>, vector<128x128xbf16>, vector<8x128xf32> -> vector<8x128xf32>
    %c0_9 = arith.constant 0 : index
    %c0_10 = arith.constant 0 : index
    %12 = vector.load %arg5[%c0_9, %c0_10] : memref<1x128xf32, #tpu.memory_space<vmem>>, vector<1x128xf32>
    %13 = vector.broadcast %12 : vector<1x128xf32> to vector<8x128xf32>
    %14 = arith.addf %11, %13 : vector<8x128xf32>
    %cst_11 = arith.constant 0.000000e+00 : f32
    %15 = vector.broadcast %cst_11 : f32 to vector<8x128xf32>
    %16 = arith.maximumf %14, %15 : vector<8x128xf32>
    %17 = arith.truncf %16 : vector<8x128xf32> to vector<8x128xbf16>
    %c0_12 = arith.constant 0 : index
    %c0_13 = arith.constant 0 : index
    %18 = vector.load %arg6[%c0_12, %c0_13] : memref<128x128xbf16, #tpu.memory_space<vmem>>, vector<128x128xbf16>
    %cst_14 = arith.constant dense<0.000000e+00> : vector<8x128xf32>
    %19 = tpu.matmul %17, %18, %cst_14 {dimension_numbers = #tpu.dot_dimension_numbers<[1], [0], [0], [1], [0, 0, 1, 1], [], []>} : vector<8x128xbf16>, vector<128x128xbf16>, vector<8x128xf32> -> vector<8x128xf32>
    %c0_15 = arith.constant 0 : index
    %c0_16 = arith.constant 0 : index
    %20 = vector.load %arg7[%c0_15, %c0_16] : memref<1x128xf32, #tpu.memory_space<vmem>>, vector<1x128xf32>
    %21 = vector.broadcast %20 : vector<1x128xf32> to vector<8x128xf32>
    %22 = arith.addf %19, %21 : vector<8x128xf32>
    %cst_17 = arith.constant 0.000000e+00 : f32
    %23 = vector.broadcast %cst_17 : f32 to vector<8x128xf32>
    %24 = arith.maximumf %22, %23 : vector<8x128xf32>
    %25 = arith.truncf %24 : vector<8x128xf32> to vector<8x128xbf16>
    %c0_18 = arith.constant 0 : index
    %c0_19 = arith.constant 0 : index
    %26 = vector.load %arg8[%c0_18, %c0_19] : memref<128x128xbf16, #tpu.memory_space<vmem>>, vector<128x128xbf16>
    %cst_20 = arith.constant dense<0.000000e+00> : vector<8x128xf32>
    %27 = tpu.matmul %25, %26, %cst_20 {dimension_numbers = #tpu.dot_dimension_numbers<[1], [0], [0], [1], [0, 0, 1, 1], [], []>} : vector<8x128xbf16>, vector<128x128xbf16>, vector<8x128xf32> -> vector<8x128xf32>
    %c0_21 = arith.constant 0 : index
    %c0_22 = arith.constant 0 : index
    %28 = vector.load %arg9[%c0_21, %c0_22] : memref<1x128xf32, #tpu.memory_space<vmem>>, vector<1x128xf32>
    %29 = vector.broadcast %28 : vector<1x128xf32> to vector<8x128xf32>
    %30 = arith.addf %27, %29 : vector<8x128xf32>
    %cst_23 = arith.constant 0.000000e+00 : f32
    %31 = vector.broadcast %cst_23 : f32 to vector<8x128xf32>
    %32 = arith.maximumf %30, %31 : vector<8x128xf32>
    %33 = vector.extract_strided_slice %32 {offsets = [0, 0], sizes = [8, 8], strides = [1, 1]} : vector<8x128xf32> to vector<8x8xf32>
    %c0_24 = arith.constant 0 : index
    %c0_25 = arith.constant 0 : index
    %34 = vector.load %arg10[%c0_24, %c0_25] : memref<8x8xf32, #tpu.memory_space<vmem>>, vector<8x8xf32>
    tpu.vector_store %arg10[%c0_24, %c0_25], %33 {strides = array<i32>} : memref<8x8xf32, #tpu.memory_space<vmem>>, vector<8x8xf32>,
    return
  }
  func.func @transform_0(%arg0: i32) -> (i32, i32) {
    %c0_i32 = arith.constant 0 : i32
    %c0_i32_0 = arith.constant 0 : i32
    return %arg0, %c0_i32 : i32, i32
  }
  func.func @transform_1(%arg0: i32) -> (i32, i32) {
    %c0_i32 = arith.constant 0 : i32
    %c0_i32_0 = arith.constant 0 : i32
    %c0_i32_1 = arith.constant 0 : i32
    return %c0_i32, %c0_i32_0 : i32, i32
  }
  func.func @transform_2(%arg0: i32) -> (i32, i32) {
    %c0_i32 = arith.constant 0 : i32
    %c0_i32_0 = arith.constant 0 : i32
    %c0_i32_1 = arith.constant 0 : i32
    return %c0_i32, %c0_i32_0 : i32, i32
  }
  func.func @transform_3(%arg0: i32) -> (i32, i32) {
    %c0_i32 = arith.constant 0 : i32
    %c0_i32_0 = arith.constant 0 : i32
    %c0_i32_1 = arith.constant 0 : i32
    return %c0_i32, %c0_i32_0 : i32, i32
  }
  func.func @transform_4(%arg0: i32) -> (i32, i32) {
    %c0_i32 = arith.constant 0 : i32
    %c0_i32_0 = arith.constant 0 : i32
    %c0_i32_1 = arith.constant 0 : i32
    return %c0_i32, %c0_i32_0 : i32, i32
  }
  func.func @transform_5(%arg0: i32) -> (i32, i32) {
    %c0_i32 = arith.constant 0 : i32
    %c0_i32_0 = arith.constant 0 : i32
    %c0_i32_1 = arith.constant 0 : i32
    return %c0_i32, %c0_i32_0 : i32, i32
  }
  func.func @transform_6(%arg0: i32) -> (i32, i32) {
    %c0_i32 = arith.constant 0 : i32
    %c0_i32_0 = arith.constant 0 : i32
    %c0_i32_1 = arith.constant 0 : i32
    return %c0_i32, %c0_i32_0 : i32, i32
  }
  func.func @transform_7(%arg0: i32) -> (i32, i32) {
    %c0_i32 = arith.constant 0 : i32
    %c0_i32_0 = arith.constant 0 : i32
    %c0_i32_1 = arith.constant 0 : i32
    return %c0_i32, %c0_i32_0 : i32, i32
  }
  func.func @transform_8(%arg0: i32) -> (i32, i32) {
    %c0_i32 = arith.constant 0 : i32
    %c0_i32_0 = arith.constant 0 : i32
    %c0_i32_1 = arith.constant 0 : i32
    return %c0_i32, %c0_i32_0 : i32, i32
  }
  func.func @transform_9(%arg0: i32) -> (i32, i32) {
    %c0_i32 = arith.constant 0 : i32
    %c0_i32_0 = arith.constant 0 : i32
    return %arg0, %c0_i32 : i32, i32
  }
}

</mosaic_0001>

<bundles_post_ra>
// kernel: tpu_custom_call.1
= control target key start
LH: loop header
LB: loop body
LE: loop exit
PB: predicated region body
PF: predicated region fallthrough
CT: control target
= control target key end

     0   :  { %s1710_s0 = inlined_call_operand.hbm [shape: f32[16,32], index: 0, kind: input, shape index: {}]   ;;  %s1711_s1 = inlined_call_operand.hbm [shape: bf16[32,128], index: 1, kind: input, shape index: {}]   ;;  %s1712_s2 = inlined_call_operand.vmem [shape: f32[1,128], index: 2, kind: input, shape index: {}]   ;;  %s1713_s3 = inlined_call_operand.hbm [shape: bf16[128,128], index: 3, kind: input, shape index: {}]   ;;  %s1714_s4 = inlined_call_operand.vmem [shape: f32[1,128], index: 4, kind: input, shape index: {}]   ;;  %s1715_s5 = inlined_call_operand.hbm [shape: bf16[128,128], index: 5, kind: input, shape index: {}]   ;;  %s1716_s6 = inlined_call_operand.vmem [shape: f32[1,128], index: 6, kind: input, shape index: {}]   ;;  %s1717_s7 = inlined_call_operand.hbm [shape: bf16[128,128], index: 7, kind: input, shape index: {}]   ;;  %s1718_s8 = inlined_call_operand.vmem [shape: f32[1,128], index: 8, kind: input, shape index: {}]   ;;  %s1719_s9 = inlined_call_operand.vmem [shape: f32[16,8], index: 9, kind: output, shape index: {}]  }
   0x1   :  { %1722 = sst [smem:[#allocation13_spill]] %s1719_s9 }
   0x2   :  { %14 = vsyncpa [#allocation3], 0 }
   0x3   :  { %16 = vsyncpa [#allocation3 + $0x1], 0 }
   0x4   :  { %17 = vsyncpa [#allocation5], 0 }
   0x5   :  { %18 = vsyncpa [#allocation8], 0  ;;  %s1423_s30 = smov 0   ;;  %s1425_s10 = smov 0  }
   0x6   :  { %s1427_s11 = smov 0   ;;  %s1429_s12 = smov 0  }
   0x7 LB: > { %s1364_s13 = smov [#allocation4]   ;;  %s1444_s15 = sadd.s32 4294967295, %s1362_s12   ;;  %s1362_s12 = sphi %s1429_s12, %s1738_s12   ;;  %s1358_s11 = sphi %s1427_s11, %s1737_s11   ;;  %s1354_s10 = sphi %s1425_s10, %s1736_s10   ;;  %s1350_s30 = sphi %s1423_s30, %s1735_s30  }
   0x8   : > { %s261_s14 = sshll.u32 %s1364_s13, 4  ;;  %p922_p0 = scmp.ge.s32.totalorder %s1362_s12, 1  ;;  %s1449_s14 = int_to_ptr.vmem [resolvable:$true] %s261_s14 }
   0x9   : > { %p1720_p1 = scmp.eq.s32.totalorder %s1444_s15, 0  ;;  %p249_p2 = scmp.lt.s32.totalorder %s1362_s12, 3 }
   0xa   : > { %s1365_s17 = smov [#allocation7]   ;;  %s1366_s20 = smov [#allocation6]  }
   0xb   : > { %p1451_p3 = pnand %p922_p0, %p249_p2  ;;  %s293_s18 = sshll.u32 %s1365_s17, 4  ;;  %s1463_s18 = int_to_ptr.vmem [resolvable:$true] %s293_s18 }
   0xc   : > { %s277_s21 = sshll.u32 %s1366_s20, 4  ;;  %s1178_s24 = scalar_lea.hbm %s1711_s1, 256  ;;  %s1465_s21 = int_to_ptr.vmem [resolvable:$true] %s277_s21 }
   0xd   : > { %s1723_s16 = scalar_select %p1451_p3, 1, 0 }
   0xe   : > { %p1086_p4 = pneg %p1451_p3  ;;  %p1179_p6 = scmp.ne.s32.totalorder %s1711_s1, %s1178_s24 }
   0xf   : > { %p1185_p10 = scmp.lt.u32.totalorder %s1178_s24, %s1711_s1 }
  0x10   : > { %p1459_p5 = pnand %p1086_p4, %p1720_p1 }
  0x12   : > { %p1475_p7 = pneg %p1459_p5 }
  0x14   : > { %p1181_p8 = pnand %p1475_p7, %p1179_p6 }
  0x16   : > { %p1182_p9 = pneg %p1181_p8 }
  0x18   : > { %p1187_p11 = pnand %p1185_p10, %p1182_p9 }
  0x1a   : > { %1190 = shalt.err (!%p1187_p11)
}
  0x1b   : > { %s1191_s13 = scalar_lea.vmem %s1449_s14, 256  ;;  %p1199_p2 = scmp.lt.s32.totalorder %s1449_s14, %s1449_s14 }
  0x1c   : > { %p1192_p12 = scmp.ne.s32.totalorder %s1449_s14, %s1191_s13  ;;  %p1200_p4 = scmp.lt.s32.totalorder %s1191_s13, %s1191_s13 }
  0x1e   : > { %p1194_p13 = pnand %p1192_p12, %p1475_p7  ;;  %p1201_p6 = por %p1200_p4, %p1199_p2 }
  0x20   : > { %p1195_p0 = pneg %p1194_p13 }
  0x22   : > { %p1202_p8 = pnand %p1201_p6, %p1195_p0 }
  0x24   : > { %1205 = shalt.err (!%p1202_p8)
}
  0x25   : > { %s1367_s17 = smov 64   ;;  %s1368_s20 = smov 4  }
  0x26   : > { %1089 = dma.hbm_to_vmem [thread:$0]  (!%p1459_p5), %s1711_s1, 256, %s1449_s14, [#allocation5], %s1367_s17, %s1367_s17, %s1368_s20  }
  0x27   : > { %s1206_s26 = scalar_lea.hbm %s1715_s5, 1024 }
  0x28   : > { %p1207_p9 = scmp.ne.s32.totalorder %s1715_s5, %s1206_s26  ;;  %p1213_p12 = scmp.lt.u32.totalorder %s1206_s26, %s1715_s5 }
  0x2a   : > { %p1209_p10 = pnand %p1207_p9, %p1475_p7 }
  0x2c   : > { %p1210_p11 = pneg %p1209_p10 }
  0x2e   : > { %p1215_p13 = pnand %p1213_p12, %p1210_p11 }
  0x30   : > { %1218 = shalt.err (!%p1215_p13)
}
  0x31   : > { %s1219_s14 = scalar_lea.vmem %s1463_s18, 1024  ;;  %p1227_p6 = scmp.lt.s32.totalorder %s1463_s18, %s1463_s18 }
  0x32   : > { %p1220_p0 = scmp.ne.s32.totalorder %s1463_s18, %s1219_s14  ;;  %p1228_p8 = scmp.lt.s32.totalorder %s1219_s14, %s1219_s14 }
  0x34   : > { %p1222_p2 = pnand %p1220_p0, %p1475_p7  ;;  %p1229_p9 = por %p1228_p8, %p1227_p6 }
  0x36   : > { %p1223_p4 = pneg %p1222_p2 }
  0x38   : > { %p1230_p10 = pnand %p1229_p9, %p1223_p4 }
  0x3a   : > { %1233 = shalt.err (!%p1230_p10)
}
  0x3b   : > { %1095 = dma.hbm_to_vmem [thread:$0]  (!%p1459_p5), %s1715_s5, 1024, %s1463_s18, [#allocation8], %s1367_s17, %s1367_s17, %s1368_s20  }
  0x3c   : > { %s1234_s25 = scalar_lea.hbm %s1713_s3, 1024 }
  0x3d   : > { %p1235_p11 = scmp.ne.s32.totalorder %s1713_s3, %s1234_s25  ;;  %p1241_p0 = scmp.lt.u32.totalorder %s1234_s25, %s1713_s3 }
  0x3f   : > { %p1237_p12 = pnand %p1235_p11, %p1475_p7 }
  0x41   : > { %p1238_p13 = pneg %p1237_p12 }
  0x43   : > { %p1243_p2 = pnand %p1241_p0, %p1238_p13 }
  0x45   : > { %1246 = shalt.err (!%p1243_p2)
}
  0x46   : > { %s1247_s18 = scalar_lea.vmem %s1465_s21, 1024  ;;  %p1255_p9 = scmp.lt.s32.totalorder %s1465_s21, %s1465_s21 }
  0x47   : > { %p1248_p4 = scmp.ne.s32.totalorder %s1465_s21, %s1247_s18  ;;  %p1256_p10 = scmp.lt.s32.totalorder %s1247_s18, %s1247_s18 }
  0x49   : > { %p1250_p6 = pnand %p1248_p4, %p1475_p7  ;;  %p1257_p11 = por %p1256_p10, %p1255_p9 }
  0x4b   : > { %p1251_p8 = pneg %p1250_p6 }
  0x4d   : > { %p1258_p12 = pnand %p1257_p11, %p1251_p8 }
  0x4f   : > { %1261 = shalt.err (!%p1258_p12)
}
  0x50   : > { %1092 = dma.hbm_to_vmem [thread:$0]  (!%p1459_p5), %s1713_s3, 1024, %s1465_s21, [#allocation5], %s1367_s17, %s1367_s17, %s1368_s20  }
  0x51   : > { %s1369_s22 = smov [#allocation9]   ;;  %s1262_s26 = scalar_lea.hbm %s1717_s7, 1024 }
  0x52   : > { %s309_s23 = sshll.u32 %s1369_s22, 4  ;;  %p1263_p13 = scmp.ne.s32.totalorder %s1717_s7, %s1262_s26  ;;  %s310_s23 = int_to_ptr.vmem [resolvable:$true] %s309_s23 }
  0x53   : > { %p1269_p4 = scmp.lt.u32.totalorder %s1262_s26, %s1717_s7 }
  0x54   : > { %p1265_p0 = pnand %p1263_p13, %p1475_p7 }
  0x56   : > { %p1266_p2 = pneg %p1265_p0 }
  0x58   : > { %p1271_p6 = pnand %p1269_p4, %p1266_p2 }
  0x5a   : > { %1274 = shalt.err (!%p1271_p6)
}
  0x5b   : > { %s1275_s21 = scalar_lea.vmem %s310_s23, 1024  ;;  %p1283_p11 = scmp.lt.s32.totalorder %s310_s23, %s310_s23 }
  0x5c   : > { %p1276_p8 = scmp.ne.s32.totalorder %s310_s23, %s1275_s21  ;;  %p1284_p12 = scmp.lt.s32.totalorder %s1275_s21, %s1275_s21 }
  0x5e   : > { %p1278_p9 = pnand %p1276_p8, %p1475_p7  ;;  %p1285_p1 = por %p1284_p12, %p1283_p11 }
  0x60   : > { %p1279_p10 = pneg %p1278_p9 }
  0x62   : > { %p1286_p3 = pnand %p1285_p1, %p1279_p10 }
  0x64   : > { %1289 = shalt.err (!%p1286_p3)
}
  0x65   : > { %1098 = dma.hbm_to_vmem [thread:$0]  (!%p1459_p5), %s1717_s7, 1024, %s310_s23, [#allocation8], %s1367_s17, %s1367_s17, %s1368_s20  }
  0x66   : > { %s1573_s19 = sadd.s32 1, %s1362_s12   ;;  %s31_s27 = sadd.s32 1, %s1358_s11 }
  0x67   : > { %s28_s22 = ssub.s32 %s1362_s12, %s1573_s19  ;;  %p38_p1 = scmp.ne.s32.totalorder %s1358_s11, %s1354_s10 }
  0x68   : > { %p29_p3 = scmp.eq.s32.totalorder %s28_s22, 0  ;;  %p39_p7 = scmp.eq.s32.totalorder %s1362_s12, 0 }
  0x69   : > { %p44_p13 = scmp.ne.s32.totalorder %s1354_s10, %s1350_s30  ;;  %p1107_p0 = scmp.lt.s32.totalorder %s1362_s12, 2 }
  0x6a   : > { %s1585_s24 = scalar_select %p29_p3, %s1358_s11, %s31_s27  }
  0x6b   : > { %p40_p2 = por %p39_p7, %p38_p1  ;;  %p1726_p4 = scmp.eq.s32.totalorder %s1444_s15, 0 }
  0x6c   : > { %s326_s26 = sand.u32 1, %s1358_s11   ;;  %s929_s17 = sshll.u32 %s1362_s12, 7 }
  0x6d   : > { %p1589_p6 = por %p1726_p4, %p44_p13  ;;  %s928_s20 = sshll.u32 %s326_s26, 3 }
  0x6e   : > { %s1598_s29 = scalar_lea.hbm %s1710_s0, %s929_s17  ;;  %s330_s30 = scalar_lea.vmem [#allocation2], %s928_s20 }
  0x6f   : > { %s337_s13 = sshll.u32 %s330_s30, 4  ;;  %p1600_p5 = pnand %p1107_p0, %p40_p2  ;;  %s1604_s13 = int_to_ptr.vmem [resolvable:$true] %s337_s13 }
  0x70   : > { %s327_s12 = scalar_lea.sflag [#allocation3], %s326_s26  ;;  %s1290_s21 = scalar_lea.hbm %s1598_s29, 128 }
  0x71   : > { %p1291_p8 = scmp.ne.s32.totalorder %s1598_s29, %s1290_s21  ;;  %p1292_p9 = pneg %p1600_p5 }
  0x72   : > { %s1295_s27 = scalar_lea.hbm %s1710_s0, 256  ;;  %p1296_p12 = scmp.lt.u32.totalorder %s1598_s29, %s1710_s0 }
  0x73   : > { %p1293_p10 = pnand %p1292_p9, %p1291_p8  ;;  %p1297_p1 = scmp.lt.u32.totalorder %s1295_s27, %s1290_s21 }
  0x74   : > { %p1299_p7 = scmp.lt.u32.totalorder %s1290_s21, %s1598_s29 }
  0x75   : > { %p1294_p11 = pneg %p1293_p10  ;;  %p1298_p3 = por %p1297_p1, %p1296_p12 }
  0x77   : > { %p1300_p13 = por %p1299_p7, %p1298_p3 }
  0x79   : > { %p1301_p0 = pnand %p1300_p13, %p1294_p11 }
  0x7b   : > { %1304 = shalt.err (!%p1301_p0)
}
  0x7c   : > { %s1305_s26 = scalar_lea.vmem %s1604_s13, 128  ;;  %s1370_s20 = smov [#allocation2]  }
  0x7d   : > { %p1306_p2 = scmp.ne.s32.totalorder %s1604_s13, %s1305_s26  ;;  %s1310_s23 = sshll.u32 %s1370_s20, 4  ;;  %s1311_s23 = int_to_ptr.vmem [resolvable:$false] %s1310_s23 }
  0x7e   : > { %s1312_s28 = scalar_lea.vmem %s1311_s23, 256  ;;  %p1313_p10 = scmp.lt.s32.totalorder %s1604_s13, %s1311_s23 }
  0x7f   : > { %p1308_p4 = pnand %p1306_p2, %p1292_p9  ;;  %p1314_p12 = scmp.lt.s32.totalorder %s1312_s28, %s1305_s26 }
  0x81   : > { %p1309_p8 = pneg %p1308_p4  ;;  %p1315_p1 = por %p1314_p12, %p1313_p10 }
  0x83   : > { %p1316_p3 = pnand %p1315_p1, %p1309_p8 }
  0x85   : > { %1319 = shalt.err (!%p1316_p3)
}
  0x86   : > { %1102 = dma.hbm_to_vmem [thread:$0]  (!%p1600_p5), %s1598_s29, 128, %s1604_s13, %s327_s12  }
  0x87   : > { %p1729_p11 = scmp.ne.s32.totalorder %s1723_s16, 0 }
  0x88   : > { %s348_s30 = sand.u32 (!%p1729_p11), 1, %s1354_s10  }
  0x89   : > { %346 = sbr.rel (%p1729_p11) target bundleno = 1033 (0x409), region = 56  ;;  %s931_s21 = sshll.u32 (!%p1729_p11), %s348_s30, 3 }
  0x8a   : > { %s349_s14 = scalar_lea.sflag (!%p1729_p11), [#allocation3], %s348_s30  ;;  %s352_s9 = scalar_lea.vmem (!%p1729_p11), [#allocation2], %s931_s21 }
  0x90   : > { %1337 = dma.done.wait (%p1589_p6), %s349_s14, 128  }
  0x91   : > { %1339 = vsyncadd (%p1589_p6), %s349_s14, 4294967168  ;;  %p1730_p9 = scmp.eq.s32.totalorder %s1444_s15, 0 }
  0x93   : > { %1341 = dma.done.wait (%p1730_p9), [#allocation5], 1280   ;;  %p1731_p7 = pmov %p1730_p9 }
  0x95   : > { %1343 = vsyncadd (%p1731_p7), [#allocation5], 4294966016  ;;  %p1732_p5 = pmov %p1731_p7 }
  0x97   : > { %1345 = dma.done.wait (%p1732_p5), [#allocation8], 2048   ;;  %p1733_p13 = pmov %p1732_p5 }
  0x98   : > { %v1371_v0 = vmov 0.0   ;;  %vm1372_vm0 = vmmov 0   ;;  %v1152_v1 = vld [vmem:[#allocation4] sm:$0xff]   ;;  %v1153_v2 = vld [vmem:[#allocation4 + $0x8] sm:$0xff]   ;;  %v407_v3 = vld [vmem:[%s352_s9] sm:$0xff]  ;;  %vm432_vm1 = vcmask 261120  }
  0x99   : > { %1347 = vsyncadd (%p1733_p13), [#allocation8], 4294965248  ;;  %1000 = vmatprep.subr.bf16.mxu0 %v1371_v0  ;;  %1004 = vmatprep.mubr.msk.bf16.mxu0 %vm1372_vm0, %v1371_v0  ;;  %v1154_v4 = vld [vmem:[#allocation6] sm:$0xff]   ;;  %v408_v5 = vpack.c.bf16 %v407_v3, %v407_v3  ;;  %v1155_v6 = vld [vmem:[#allocation6 + $0x8] sm:$0xff]   ;;  %p402_p6 = scmp.lt.s32.totalorder %s1444_s15, 1  ;;  %s1734_s23 = sld [smem:[#allocation13_spill]] }
  0x9a   : > { %1008 = vmatprep.subr.bf16.mxu1 %v1371_v0  ;;  %1024 = vmatprep.mubr.msk.bf16.mxu1 %vm1372_vm0, %v1371_v0  ;;  %v1156_v7 = vld [vmem:[#allocation6 + $0x10] sm:$0xff]   ;;  %v1157_v8 = vld [vmem:[#allocation6 + $0x18] sm:$0xff]   ;;  %v1158_v9 = vld [vmem:[#allocation6 + $0x20] sm:$0xff]   ;;  %vm816_vm2 = vcmask 64512  }
  0x9b   : > { %1001 = vmatpush3.bf16.msra.mxu0 %v1152_v1  ;;  %1009 = vmatpush3.bf16.msra.mxu1 %v1154_v4  ;;  %v1159_v10 = vld [vmem:[#allocation6 + $0x28] sm:$0xff]   ;;  %v1160_v11 = vld [vmem:[#allocation6 + $0x30] sm:$0xff]   ;;  %v1161_v12 = vld [vmem:[#allocation6 + $0x38] sm:$0xff]   ;;  %s1740_s15 = smov (!%p402_p6, %s1444_s15), 1 }
  0x9c   : > { %1002 = vmatprep.subr.bf16.mxu0 %v1371_v0  ;;  %1010 = vmatprep.subr.bf16.mxu1 %v1371_v0  ;;  %v1162_v13 = vld [vmem:[#allocation7] sm:$0xff]   ;;  %v1163_v14 = vld [vmem:[#allocation7 + $0x8] sm:$0xff]   ;;  %v1164_v15 = vld [vmem:[#allocation7 + $0x10] sm:$0xff]   ;;  %s936_s17 = sshll.u32 %s1740_s15, 3 }
  0x9d   : > { %v1165_v16 = vld [vmem:[#allocation7 + $0x18] sm:$0xff]   ;;  %v1166_v17 = vld [vmem:[#allocation7 + $0x20] sm:$0xff]   ;;  %v1167_v18 = vld [vmem:[#allocation7 + $0x28] sm:$0xff]  }
  0x9e   : > { %v937_v19 = vld [vmem:[%s1712_s2] ss:$0 sm:$0xff]  ;;  %v1169_v28 = vld [vmem:[#allocation7 + $0x38] sm:$0xff]   ;;  %v1170_v29 = vld [vmem:[#allocation9] sm:$0xff]  }
  0x9f   : > { %1003 = vmatpush3.bf16.msra.mxu0 %v1153_v2  ;;  %1011 = vmatpush3.bf16.msra.mxu1 %v1155_v6  ;;  %v1168_v27 = vld [vmem:[#allocation7 + $0x30] sm:$0xff]   ;;  %v1171_v30 = vld [vmem:[#allocation9 + $0x8] sm:$0xff]   ;;  %v1173_v32 = vld [vmem:[#allocation9 + $0x18] sm:$0xff]   ;;  %s405_s28 = scalar_lea.vmem %s1734_s23, %s936_s17 }
  0xa0   : > { %1028 = vmatprep.subr.bf16.mxu0 %v1371_v0  ;;  %1012 = vmatprep.subr.bf16.mxu1 %v1371_v0  ;;  %v1172_v31 = vld [vmem:[#allocation9 + $0x10] sm:$0xff]   ;;  %v1174_v33 = vld [vmem:[#allocation9 + $0x20] sm:$0xff]   ;;  %v1175_v34 = vld [vmem:[#allocation9 + $0x28] sm:$0xff]  }
  0xa1   : > { %v941_v35 = vld [vmem:[%s1714_s4] ss:$0 sm:$0xff]  ;;  %v1177_v44 = vld [vmem:[#allocation9 + $0x38] sm:$0xff]  }
  0xa2   : > { %1005 = vmatmul.mubr.msk.bf16.vlgmr.msra.gmra.mrb[0].mxu0 %vm432_vm1, %v408_v5  ;;  %v1176_v43 = vld [vmem:[#allocation9 + $0x30] sm:$0xff]  }
  0xa3   : > { %1044 = vmatprep.mubr.msk.bf16.mxu0 %vm1372_vm0, %v1371_v0  ;;  %1013 = vmatpush3.bf16.msra.mxu1 %v1156_v7  ;;  %v950_v45 = vld [vmem:[%s1716_s6] ss:$0 sm:$0xff] }
  0xa4   : > { %1014 = vmatprep.subr.bf16.mxu1 %v1371_v0  ;;  %1029 = vmatpush3.bf16.msra.mxu0 %v1162_v13  ;;  %v959_v53 = vld [vmem:[%s1718_s8] ss:$0 sm:$0xff] }
  0xa5   : > { %1030 = vmatprep.subr.bf16.mxu0 %v1371_v0 }
  0xa7   : > { %1015 = vmatpush3.bf16.msra.mxu1 %v1157_v8 }
  0xa8   : > { %1016 = vmatprep.subr.bf16.mxu1 %v1371_v0  ;;  %1031 = vmatpush3.bf16.msra.mxu0 %v1163_v14 }
  0xa9   : > { %1032 = vmatprep.subr.bf16.mxu0 %v1371_v0 }
  0xab   : > { %1017 = vmatpush3.bf16.msra.mxu1 %v1158_v9 }
  0xac   : > { %1018 = vmatprep.subr.bf16.mxu1 %v1371_v0  ;;  %1033 = vmatpush3.bf16.msra.mxu0 %v1164_v15 }
  0xad   : > { %1034 = vmatprep.subr.bf16.mxu0 %v1371_v0 }
  0xaf   : > { %1019 = vmatpush3.bf16.msra.mxu1 %v1159_v10 }
  0xb0   : > { %1020 = vmatprep.subr.bf16.mxu1 %v1371_v0  ;;  %1035 = vmatpush3.bf16.msra.mxu0 %v1165_v16 }
  0xb1   : > { %1036 = vmatprep.subr.bf16.mxu0 %v1371_v0 }
  0xb3   : > { %1021 = vmatpush3.bf16.msra.mxu1 %v1160_v11 }
  0xb4   : > { %1022 = vmatprep.subr.bf16.mxu1 %v1371_v0  ;;  %1037 = vmatpush3.bf16.msra.mxu0 %v1166_v17 }
  0xb5   : > { %1038 = vmatprep.subr.bf16.mxu0 %v1371_v0 }
  0xb7   : > { %1023 = vmatpush3.bf16.msra.mxu1 %v1161_v12 }
  0xb8   : > { %1048 = vmatprep.subr.bf16.mxu1 %v1371_v0  ;;  %1039 = vmatpush3.bf16.msra.mxu0 %v1167_v18 }
  0xb9   : > { %1040 = vmatprep.subr.bf16.mxu0 %v1371_v0 }
  0xbc   : > { %1041 = vmatpush3.bf16.msra.mxu0 %v1168_v27 }
  0xbd   : > { %1042 = vmatprep.subr.bf16.mxu0 %v1371_v0 }
  0xc0   : > { %1043 = vmatpush3.bf16.msra.mxu0 %v1169_v28 }
 0x175   : > { %v470_v20 = vpop.f32.mrb[0].mxu0 }
 0x176   : > { %v471_v21 = vadd.f32 %v937_v19, %v470_v20  ;;  %v1006_v22 = vpop.f32.mrb[1].mxu0 }
 0x177   : > { %v473_v23 = vpop.f32.mrb[2].mxu0 }
 0x178   : > { %v476_v24 = vmax.f32 %v471_v21, 0.0  ;;  %v1007_v25 = vpop.f32.mrb[3].mxu0 }
 0x17a   : > { %v477_v26 = vpack.c.bf16 %v476_v24, %v476_v24 }
 0x17c   : > { %1025 = vmatmul.mubr.bf16.vlgmr.msra.gmra.mrb[0].mxu1 %v477_v26 }
 0x17d   : > { %1064 = vmatprep.mubr.msk.bf16.mxu1 %vm1372_vm0, %v1371_v0  ;;  %1049 = vmatpush3.bf16.msra.mxu1 %v1170_v29 }
 0x17e   : > { %1050 = vmatprep.subr.bf16.mxu1 %v1371_v0 }
 0x181   : > { %1051 = vmatpush3.bf16.msra.mxu1 %v1171_v30 }
 0x182   : > { %1052 = vmatprep.subr.bf16.mxu1 %v1371_v0 }
 0x185   : > { %1053 = vmatpush3.bf16.msra.mxu1 %v1172_v31 }
 0x186   : > { %1054 = vmatprep.subr.bf16.mxu1 %v1371_v0 }
 0x189   : > { %1055 = vmatpush3.bf16.msra.mxu1 %v1173_v32 }
 0x18a   : > { %1056 = vmatprep.subr.bf16.mxu1 %v1371_v0 }
 0x18d   : > { %1057 = vmatpush3.bf16.msra.mxu1 %v1174_v33 }
 0x18e   : > { %1058 = vmatprep.subr.bf16.mxu1 %v1371_v0 }
 0x191   : > { %1059 = vmatpush3.bf16.msra.mxu1 %v1175_v34 }
 0x192   : > { %1060 = vmatprep.subr.bf16.mxu1 %v1371_v0 }
 0x195   : > { %1061 = vmatpush3.bf16.msra.mxu1 %v1176_v43 }
 0x196   : > { %1062 = vmatprep.subr.bf16.mxu1 %v1371_v0 }
 0x199   : > { %1063 = vmatpush3.bf16.msra.mxu1 %v1177_v44 }
 0x24f   : > { %v583_v36 = vpop.f32.mrb[0].mxu1 }
 0x250   : > { %v584_v37 = vadd.f32 %v941_v35, %v583_v36  ;;  %v1026_v38 = vpop.f32.mrb[1].mxu1 }
 0x251   : > { %v586_v39 = vpop.f32.mrb[2].mxu1 }
 0x252   : > { %v589_v40 = vmax.f32 %v584_v37, 0.0  ;;  %v1027_v41 = vpop.f32.mrb[3].mxu1 }
 0x254   : > { %v590_v42 = vpack.c.bf16 %v589_v40, %v589_v40 }
 0x256   : > { %1045 = vmatmul.mubr.bf16.vlgmr.msra.gmra.mrb[4].mxu0 %v590_v42 }
 0x329   : > { %v696_v46 = vpop.f32.mrb[4].mxu0 }
 0x32a   : > { %v697_v47 = vadd.f32 %v950_v45, %v696_v46  ;;  %v1046_v48 = vpop.f32.mrb[5].mxu0 }
 0x32b   : > { %v699_v49 = vpop.f32.mrb[6].mxu0 }
 0x32c   : > { %v702_v50 = vmax.f32 %v697_v47, 0.0  ;;  %v1047_v51 = vpop.f32.mrb[7].mxu0 }
 0x32e   : > { %v703_v52 = vpack.c.bf16 %v702_v50, %v702_v50 }
 0x330   : > { %1065 = vmatmul.mubr.bf16.vlgmr.msra.gmra.mrb[4].mxu1 %v703_v52 }
 0x403   : > { %v809_v54 = vpop.f32.mrb[4].mxu1 }
 0x404   : > { %v810_v55 = vadd.f32 %v959_v53, %v809_v54  ;;  %v1066_v56 = vpop.f32.mrb[5].mxu1 }
 0x405   : > { %v812_v57 = vpop.f32.mrb[6].mxu1 }
 0x406   : > { %v815_v58 = vmax.f32 %v810_v55, 0.0  ;;  %v1067_v59 = vpop.f32.mrb[7].mxu1 }
 0x408   : > { %817 = vst.msk [vmem:[%s405_s28] sm:$0xff] %vm816_vm2, %v815_v58 }
 0x409 PF: > { %p21_p0 = scmp.ge.s32.totalorder %s1573_s19, 4   ;;  %s1735_s30 = smov %s1354_s10 }
 0x40a   : > { %s1736_s10 = smov %s1358_s11  ;;  %s1737_s11 = smov %s1585_s24 }
 0x40b   : > { %s1738_s12 = smov %s1573_s19  ;;  %23 = sbr.rel (!%p21_p0) target bundleno = 7 (0x7), region = 112 }
 0x412   :  { %837 = vsyncpa [#allocation3], 1 }
 0x413   :  { %839 = vsyncpa [#allocation3 + $0x1], 1 }
 0x414   :  { %840 = vsyncpa [#allocation5], 1 }
 0x415   :  { %841 = vsyncpa [#allocation8], 1 }

</bundles_post_ra>
